<compile_context>
chip_gen: v7x
topology: tpu7x:2x2x1
jax: 0.10.0
libtpu: 0.0.40
codegen_flags: <defaults>
</compile_context>

<pallas_src>
import math
import numpy as np
import jax
import jax.numpy as jnp
from jax import lax
from jax.experimental import pallas as pl
from jax.experimental.pallas import tpu as pltpu

# ---------------- config (small, consistent with the module) ----------------
DIM = 64
N_HEAD = 4
N_KV_HEAD = 2
GROUP = N_HEAD // N_KV_HEAD       # 2
HEAD_DIM = DIM // N_HEAD          # 16
KV_DIM = N_KV_HEAD * HEAD_DIM     # 32
TOTAL_KV = DIM + 2 * KV_DIM       # 128  (wqkv out-features)
MULTIPLE_OF = 32
NORM_EPS = 1e-5
SEQ = 8
BATCH = 2
BS = BATCH * SEQ                  # 16 rows, batch folded into one slab


def find_multiple(n, k):
    return n if n % k == 0 else n + k - n % k


HIDDEN = find_multiple(int(2 * (4 * DIM) / 3), MULTIPLE_OF)   # 192
HPAD = 256                                                    # HIDDEN padded to lane boundary

# packed f32 const-buffer row layout (128 lanes wide)
COS_ROW = 0                       # rows [0, BS)          : cos rows (scale folded into Q cols)
SIN_ROW = BS                      # rows [BS, 2BS)        : sin rows
BIAS_ROW = 2 * BS                 # rows [2BS, 2BS+G*BS)  : causal+batch bias, lanes [0, BS)
NW_ROW = 2 * BS + GROUP * BS      # rows [64, 66)         : [attn_norm_w ; ffn_norm_w], lanes [0, DIM)
CONST_ROWS = find_multiple(NW_ROW + 2, 8)                     # 72

# packed bf16 weight-buffer column layout (64 rows)
QKV_COL = 0                       # [Wqkv | Wqkv@ROT]^T : width 2*TOTAL_KV = 256
WO_COL = 2 * TOTAL_KV             # wo^T                : width DIM (zero-padded to 128)
W13_COL = WO_COL + 128            # [w1 | w3]^T padded  : width 2*HPAD = 512
WA_COLS = W13_COL + 2 * HPAD      # 896


# ---------------------------- Pallas kernel ---------------------------------
def block_kernel(x_ref, consts_ref, wa_ref, w2_ref, out_ref):
    x = x_ref[...]                                            # (BS, D) f32, rows = b*SEQ + s

    cos = consts_ref[COS_ROW:COS_ROW + BS, :]                 # (BS, 128) f32
    sin = consts_ref[SIN_ROW:SIN_ROW + BS, :]
    bias = consts_ref[BIAS_ROW:BIAS_ROW + GROUP * BS, 0:BS]   # (GROUP*BS, BS) f32, static
    nw_attn = consts_ref[NW_ROW:NW_ROW + 1, 0:DIM]            # (1, D)
    nw_ffn = consts_ref[NW_ROW + 1:NW_ROW + 2, 0:DIM]

    # ---- attention RMSNorm (f32 elementwise) ----
    xn = x * lax.rsqrt(jnp.mean(x * x, axis=-1, keepdims=True) + NORM_EPS) * nw_attn

    # ---- fused [QKV | QKV@ROT] projection: one (BS,64)@(64,256) bf16 matmul ----
    y = jnp.dot(xn.astype(jnp.bfloat16), wa_ref[:, QKV_COL:QKV_COL + 2 * TOTAL_KV],
                preferred_element_type=jnp.float32)           # (BS, 2*TOTAL_KV) f32
    # rotary + q-scale (f32): cos has 1/sqrt(head_dim) folded into Q cols and 1.0 in V cols,
    # sin has the scale in Q cols and 0.0 in V cols (V passes through untouched).
    qkv = y[:, :TOTAL_KV] * cos + y[:, TOTAL_KV:] * sin       # (BS, 128) f32
    qkv_bf = qkv.astype(jnp.bfloat16)                         # MXU operands

    # ---- GQA attention: one score/PV matmul per KV group (heads stacked on sublanes) ----
    head_outs = []
    for g in range(N_KV_HEAD):                                # static loop, 2 groups
        h0 = GROUP * g
        q_stack = jnp.concatenate(
            [qkv_bf[:, (h0 + l) * HEAD_DIM:(h0 + l + 1) * HEAD_DIM] for l in range(GROUP)],
            axis=0)                                           # (GROUP*BS, HEAD_DIM) bf16, scale folded
        k_gT = qkv[:, DIM + g * HEAD_DIM:DIM + (g + 1) * HEAD_DIM].T.astype(jnp.bfloat16)
        v_g = qkv_bf[:, DIM + KV_DIM + g * HEAD_DIM:DIM + KV_DIM + (g + 1) * HEAD_DIM]

        # bf16 operands, f32 accumulation; bias add + softmax in f32
        s = jnp.dot(q_stack, k_gT, preferred_element_type=jnp.float32) + bias   # (GROUP*BS, BS)
        s = s - jnp.max(s, axis=-1, keepdims=True)
        p = jnp.exp(s)
        p = p * pl.reciprocal(jnp.sum(p, axis=-1, keepdims=True), approx=True)
        o_g = jnp.dot(p.astype(jnp.bfloat16), v_g,
                      preferred_element_type=jnp.float32)     # (GROUP*BS, HEAD_DIM) f32
        head_outs.extend(o_g[l * BS:(l + 1) * BS, :] for l in range(GROUP))

    # single fused output projection: lane-concat heads -> (BS, D), one dot with wo
    o_all = jnp.concatenate(head_outs, axis=1).astype(jnp.bfloat16)              # (BS, D) bf16
    attn_proj = jnp.dot(o_all, wa_ref[:, WO_COL:WO_COL + DIM],
                        preferred_element_type=jnp.float32)                      # (BS, D) f32

    h_res = x + attn_proj

    # ---- FFN RMSNorm + SwiGLU ([w1|w3] fused, zero-padded to 2*HPAD lanes) ----
    hn = h_res * lax.rsqrt(jnp.mean(h_res * h_res, axis=-1, keepdims=True) + NORM_EPS) * nw_ffn
    y13 = jnp.dot(hn.astype(jnp.bfloat16), wa_ref[:, W13_COL:W13_COL + 2 * HPAD],
                  preferred_element_type=jnp.float32)         # (BS, 2*HPAD)
    a = y13[:, :HPAD]
    b = y13[:, HPAD:]
    sa = a * pl.reciprocal(1.0 + jnp.exp(-a), approx=True)    # SiLU, exp/recip on EUP
    ff = jnp.dot((sa * b).astype(jnp.bfloat16), w2_ref[...],
                 preferred_element_type=jnp.float32)          # (BS, D)

    out_ref[...] = h_res + ff


# ------------------- one-time parameter / constant packing --------------------
def prepare_block_inputs(params, freqs_cis, batch=BATCH, seq=SEQ):
    """Done ONCE at parameter-prep time; nothing here runs on the per-forward path."""
    bs = batch * seq
    scale = 1.0 / math.sqrt(HEAD_DIM)

    # rotary cos/sin rows, tiled over QK heads and batch, q-scale folded into Q cols
    cos16 = jnp.repeat(freqs_cis[:, :, 0], 2, axis=-1)        # (S, HEAD_DIM)
    sin16 = jnp.repeat(freqs_cis[:, :, 1], 2, axis=-1)
    n_qk_heads = (DIM + KV_DIM) // HEAD_DIM                   # 6
    col_scale = jnp.concatenate([jnp.full((DIM,), scale, jnp.float32),
                                 jnp.ones((KV_DIM,), jnp.float32)])
    cos_qk = jnp.tile(cos16, (1, n_qk_heads)) * col_scale
    sin_qk = jnp.tile(sin16, (1, n_qk_heads)) * col_scale
    cos_full = jnp.concatenate([cos_qk, jnp.ones((seq, KV_DIM), jnp.float32)], axis=1)
    sin_full = jnp.concatenate([sin_qk, jnp.zeros((seq, KV_DIM), jnp.float32)], axis=1)
    cos_rows = jnp.tile(cos_full, (batch, 1))                 # (BS, 128)
    sin_rows = jnp.tile(sin_full, (batch, 1))

    # static causal + batch-block bias for stacked-head scores: (GROUP*BS, BS) -> lanes padded
    r = np.arange(GROUP * bs)[:, None] % bs                   # query token index (b*SEQ+s)
    c = np.arange(bs)[None, :]                                # key token index
    ok = ((r // seq) == (c // seq)) & ((c % seq) <= (r % seq))
    bias = np.where(ok, 0.0, -1e30).astype(np.float32)
    bias = np.pad(bias, ((0, 0), (0, TOTAL_KV - bs)))

    # norm weights, lane-padded
    nw = jnp.concatenate([params["attn_nw"], params["ffn_nw"]], axis=0)
    nw = jnp.pad(nw, ((0, 0), (0, TOTAL_KV - DIM)))

    tail = CONST_ROWS - (NW_ROW + 2)
    consts = jnp.concatenate(
        [cos_rows, sin_rows, jnp.asarray(bias), nw,
         jnp.zeros((tail, TOTAL_KV), jnp.float32)], axis=0)   # (CONST_ROWS, 128) f32

    # signed pair-permutation for rotary, folded into the QKV weight
    r2 = np.array([[0.0, 1.0], [-1.0, 0.0]], np.float32)      # (x@R)[2i]=-x[2i+1], [2i+1]=x[2i]
    rot = jnp.asarray(np.kron(np.eye(TOTAL_KV // 2, dtype=np.float32), r2))
    wqkv_big = jnp.concatenate([params["wqkv_t"], params["wqkv_t"] @ rot], axis=1)  # (D, 256)
    wo_pad = jnp.pad(params["wo_t"], ((0, 0), (0, 128 - DIM)))                      # (D, 128)
    pad = HPAD - HIDDEN
    w13 = jnp.concatenate([jnp.pad(params["w1_t"], ((0, 0), (0, pad))),
                           jnp.pad(params["w3_t"], ((0, 0), (0, pad)))], axis=1)    # (D, 512)
    wa = jnp.concatenate([wqkv_big, wo_pad, w13], axis=1).astype(jnp.bfloat16)      # (D, 896)
    w2p = jnp.pad(params["w2_t"], ((0, pad), (0, 0))).astype(jnp.bfloat16)          # (HPAD, D)

    return {"consts": consts, "wa": wa, "w2": w2p}


# ------------------------------ forward --------------------------------------
def block_forward(x, prep):
    B, S, D = x.shape
    bs = B * S
    xf = x.reshape(bs, D)

    full = lambda shape: pl.BlockSpec(shape, lambda i, _s=shape: (0,) * len(_s))
    out = pl.pallas_call(
        block_kernel,
        out_shape=jax.ShapeDtypeStruct((bs, D), jnp.float32),
        grid=(1,),                                            # single invocation, batch folded
        in_specs=[
            full((bs, D)),                     # x (per-call)
            full((CONST_ROWS, TOTAL_KV)),      # packed cos|sin|bias|norm-weights  f32
            full((DIM, WA_COLS)),              # packed [Wqkv|Wqkv@ROT | wo | w1|w3]  bf16
            full((HPAD, DIM)),                 # w2^T zero-padded                     bf16
        ],
        out_specs=full((bs, D)),
        compiler_params=pltpu.CompilerParams(dimension_semantics=("arbitrary",)),
    )(xf, prep["consts"], prep["wa"], prep["w2"])
    return out.reshape(B, S, D)


# -------------------------- pure-JAX reference --------------------------------
def _rmsnorm(x, w, eps=NORM_EPS):
    return x * lax.rsqrt(jnp.mean(x * x, axis=-1, keepdims=True) + eps) * w


def _apply_rotary(x, freqs_cis):
    xs = x.reshape(*x.shape[:-1], -1, 2)
    fc = freqs_cis.reshape(1, x.shape[1], 1, xs.shape[3], 2)
    out = jnp.stack([xs[..., 0] * fc[..., 0] - xs[..., 1] * fc[..., 1],
                     xs[..., 1] * fc[..., 0] + xs[..., 0] * fc[..., 1]], axis=-1)
    return out.reshape(*x.shape)


def block_reference(x, freqs_cis, p):
    B, S, D = x.shape
    xn = _rmsnorm(x, p["attn_nw"])
    qkv = xn @ p["wqkv_t"]
    q, k, v = jnp.split(qkv, [DIM, DIM + KV_DIM], axis=-1)
    q = q.reshape(B, S, N_HEAD, HEAD_DIM)
    k = k.reshape(B, S, N_KV_HEAD, HEAD_DIM)
    v = v.reshape(B, S, N_KV_HEAD, HEAD_DIM)
    q = _apply_rotary(q, freqs_cis)
    k = _apply_rotary(k, freqs_cis)
    q, k, v = (t.transpose(0, 2, 1, 3) for t in (q, k, v))
    k = jnp.repeat(k, N_HEAD // N_KV_HEAD, axis=1)
    v = jnp.repeat(v, N_HEAD // N_KV_HEAD, axis=1)
    s = jnp.einsum("bhqd,bhkd->bhqk", q, k) / math.sqrt(HEAD_DIM)
    causal = jnp.tril(jnp.ones((S, S), dtype=bool))
    s = jnp.where(causal[None, None], s, -jnp.inf)
    pattn = jax.nn.softmax(s, axis=-1)
    o = jnp.einsum("bhqk,bhkd->bhqd", pattn, v)
    o = o.transpose(0, 2, 1, 3).reshape(B, S, D)
    h = x + o @ p["wo_t"]
    hn = _rmsnorm(h, p["ffn_nw"])
    ff = (jax.nn.silu(hn @ p["w1_t"]) * (hn @ p["w3_t"])) @ p["w2_t"]
    return h + ff


# --------------------------------- main ---------------------------------------
if __name__ == "__main__":
    key = jax.random.PRNGKey(0)
    keys = jax.random.split(key, 9)

    params = {
        "attn_nw": 1.0 + 0.1 * jax.random.normal(keys[0], (1, DIM), jnp.float32),
        "ffn_nw": 1.0 + 0.1 * jax.random.normal(keys[1], (1, DIM), jnp.float32),
        "wqkv_t": 0.02 * jax.random.normal(keys[2], (DIM, TOTAL_KV), jnp.float32),
        "wo_t":   0.02 * jax.random.normal(keys[3], (DIM, DIM), jnp.float32),
        "w1_t":   0.02 * jax.random.normal(keys[4], (DIM, HIDDEN), jnp.float32),
        "w3_t":   0.02 * jax.random.normal(keys[5], (DIM, HIDDEN), jnp.float32),
        "w2_t":   0.02 * jax.random.normal(keys[6], (HIDDEN, DIM), jnp.float32),
    }

    x = jax.random.normal(keys[7], (BATCH, SEQ, DIM), jnp.float32)

    # rotary frequencies: (S, HEAD_DIM//2, 2) == [cos, sin]
    inv_freq = 1.0 / (10000.0 ** (jnp.arange(0, HEAD_DIM, 2, dtype=jnp.float32) / HEAD_DIM))
    angles = jnp.arange(SEQ, dtype=jnp.float32)[:, None] * inv_freq[None, :]
    freqs_cis = jnp.stack([jnp.cos(angles), jnp.sin(angles)], axis=-1)

    # one-time packing (NOT on the per-forward path)
    prep = jax.tree_util.tree_map(jax.block_until_ready, prepare_block_inputs(params, freqs_cis))

    out = block_forward(x, prep)
    out = jax.block_until_ready(out)

    ref = jax.block_until_ready(block_reference(x, freqs_cis, params))
    # tolerance accommodates bf16 MXU operands (f32 accumulation, f32 elementwise/residuals)
    np.testing.assert_allclose(np.asarray(out), np.asarray(ref), rtol=2e-2, atol=5e-3)

    print("KERNEL_OK")
</pallas_src>

<mosaic_0001>
module attributes {stable_mosaic.version = 11 : i64} {
  func.func @block_kernel(%arg0: i32, %arg1: memref<16x64xf32, #tpu.memory_space<vmem>>, %arg2: memref<72x128xf32, #tpu.memory_space<vmem>>, %arg3: memref<64x896xbf16, #tpu.memory_space<vmem>>, %arg4: memref<256x64xbf16, #tpu.memory_space<vmem>>, %arg5: memref<16x64xf32, #tpu.memory_space<vmem>>) attributes {dimension_semantics = [#tpu.dimension_semantics<arbitrary>], iteration_bounds = array<i64: 1>, scalar_prefetch = 0 : i64, scratch_operands = 0 : i64, tpu.core_type = #tpu.core_type<tc>, window_params = [{pipeline_mode = #tpu.pipeline_mode<synchronous>, transform_indices = @transform_0, window_bounds = array<i64: 16, 64>}, {pipeline_mode = #tpu.pipeline_mode<synchronous>, transform_indices = @transform_1, window_bounds = array<i64: 72, 128>}, {pipeline_mode = #tpu.pipeline_mode<synchronous>, transform_indices = @transform_2, window_bounds = array<i64: 64, 896>}, {pipeline_mode = #tpu.pipeline_mode<synchronous>, transform_indices = @transform_3, window_bounds = array<i64: 256, 64>}, {pipeline_mode = #tpu.pipeline_mode<synchronous>, transform_indices = @transform_4, window_bounds = array<i64: 16, 64>}]} {
    %c0 = arith.constant 0 : index
    %c0_0 = arith.constant 0 : index
    %0 = vector.load %arg1[%c0, %c0_0] : memref<16x64xf32, #tpu.memory_space<vmem>>, vector<16x64xf32>
    %c0_1 = arith.constant 0 : index
    %c0_2 = arith.constant 0 : index
    %1 = vector.load %arg2[%c0_1, %c0_2] : memref<72x128xf32, #tpu.memory_space<vmem>>, vector<16x128xf32>
    %c16 = arith.constant 16 : index
    %c0_3 = arith.constant 0 : index
    %2 = vector.load %arg2[%c16, %c0_3] : memref<72x128xf32, #tpu.memory_space<vmem>>, vector<16x128xf32>
    %c32 = arith.constant 32 : index
    %c0_4 = arith.constant 0 : index
    %3 = vector.load %arg2[%c32, %c0_4] : memref<72x128xf32, #tpu.memory_space<vmem>>, vector<32x16xf32>
    %c64 = arith.constant 64 : index
    %c0_5 = arith.constant 0 : index
    %4 = vector.load %arg2[%c64, %c0_5] : memref<72x128xf32, #tpu.memory_space<vmem>>, vector<1x64xf32>
    %c65 = arith.constant 65 : index
    %c0_6 = arith.constant 0 : index
    %5 = vector.load %arg2[%c65, %c0_6] : memref<72x128xf32, #tpu.memory_space<vmem>>, vector<1x64xf32>
    %6 = arith.mulf %0, %0 : vector<16x64xf32>
    %cst = arith.constant dense<0.000000e+00> : vector<16xf32>
    %7 = vector.multi_reduction <add>, %6, %cst [1] : vector<16x64xf32> to vector<16xf32>
    %8 = vector.shape_cast %7 : vector<16xf32> to vector<16x1xf32>
    %cst_7 = arith.constant 6.400000e+01 : f32
    %9 = vector.broadcast %cst_7 : f32 to vector<16x1xf32>
    %10 = arith.divf %8, %9 : vector<16x1xf32>
    %cst_8 = arith.constant 9.99999974E-6 : f32
    %11 = vector.broadcast %cst_8 : f32 to vector<16x1xf32>
    %12 = arith.addf %10, %11 : vector<16x1xf32>
    %13 = math.rsqrt %12 : vector<16x1xf32>
    %14 = vector.broadcast %13 : vector<16x1xf32> to vector<16x64xf32>
    %15 = arith.mulf %0, %14 : vector<16x64xf32>
    %16 = vector.broadcast %4 : vector<1x64xf32> to vector<16x64xf32>
    %17 = arith.mulf %15, %16 : vector<16x64xf32>
    %18 = arith.truncf %17 : vector<16x64xf32> to vector<16x64xbf16>
    %c0_9 = arith.constant 0 : index
    %c0_10 = arith.constant 0 : index
    %19 = vector.load %arg3[%c0_9, %c0_10] : memref<64x896xbf16, #tpu.memory_space<vmem>>, vector<64x256xbf16>
    %cst_11 = arith.constant dense<0.000000e+00> : vector<16x256xf32>
    %20 = tpu.matmul %18, %19, %cst_11 {dimension_numbers = #tpu.dot_dimension_numbers<[1], [0], [0], [1], [0, 0, 1, 1], [], []>} : vector<16x64xbf16>, vector<64x256xbf16>, vector<16x256xf32> -> vector<16x256xf32>
    %21 = vector.extract_strided_slice %20 {offsets = [0, 0], sizes = [16, 128], strides = [1, 1]} : vector<16x256xf32> to vector<16x128xf32>
    %22 = arith.mulf %21, %1 : vector<16x128xf32>
    %23 = vector.extract_strided_slice %20 {offsets = [0, 128], sizes = [16, 128], strides = [1, 1]} : vector<16x256xf32> to vector<16x128xf32>
    %24 = arith.mulf %23, %2 : vector<16x128xf32>
    %25 = arith.addf %22, %24 : vector<16x128xf32>
    %26 = arith.truncf %25 : vector<16x128xf32> to vector<16x128xbf16>
    %27 = vector.extract_strided_slice %26 {offsets = [0, 0], sizes = [16, 16], strides = [1, 1]} : vector<16x128xbf16> to vector<16x16xbf16>
    %28 = vector.extract_strided_slice %26 {offsets = [0, 16], sizes = [16, 16], strides = [1, 1]} : vector<16x128xbf16> to vector<16x16xbf16>
    %29 = tpu.concatenate %27, %28 in 0 : vector<16x16xbf16>, vector<16x16xbf16> -> vector<32x16xbf16>
    %30 = vector.extract_strided_slice %25 {offsets = [0, 64], sizes = [16, 16], strides = [1, 1]} : vector<16x128xf32> to vector<16x16xf32>
    %31 = tpu.transpose %30, [1, 0] : vector<16x16xf32> -> vector<16x16xf32>
    %32 = arith.truncf %31 : vector<16x16xf32> to vector<16x16xbf16>
    %33 = vector.extract_strided_slice %26 {offsets = [0, 96], sizes = [16, 16], strides = [1, 1]} : vector<16x128xbf16> to vector<16x16xbf16>
    %cst_12 = arith.constant dense<0.000000e+00> : vector<32x16xf32>
    %34 = tpu.matmul %29, %32, %cst_12 {dimension_numbers = #tpu.dot_dimension_numbers<[1], [0], [0], [1], [0, 0, 1, 1], [], []>} : vector<32x16xbf16>, vector<16x16xbf16>, vector<32x16xf32> -> vector<32x16xf32>
    %35 = arith.addf %34, %3 : vector<32x16xf32>
    %cst_13 = arith.constant dense<0xFF800000> : vector<32xf32>
    %36 = vector.multi_reduction <maximumf>, %35, %cst_13 [1] : vector<32x16xf32> to vector<32xf32>
    %37 = vector.shape_cast %36 : vector<32xf32> to vector<32x1xf32>
    %38 = vector.broadcast %37 : vector<32x1xf32> to vector<32x16xf32>
    %39 = arith.subf %35, %38 : vector<32x16xf32>
    %40 = math.exp %39 : vector<32x16xf32>
    %cst_14 = arith.constant dense<0.000000e+00> : vector<32xf32>
    %41 = vector.multi_reduction <add>, %40, %cst_14 [1] : vector<32x16xf32> to vector<32xf32>
    %42 = vector.shape_cast %41 : vector<32xf32> to vector<32x1xf32>
    %43 = tpu.reciprocal %42 {approx = true} : vector<32x1xf32> -> vector<32x1xf32>
    %44 = vector.broadcast %43 : vector<32x1xf32> to vector<32x16xf32>
    %45 = arith.mulf %40, %44 : vector<32x16xf32>
    %46 = arith.truncf %45 : vector<32x16xf32> to vector<32x16xbf16>
    %cst_15 = arith.constant dense<0.000000e+00> : vector<32x16xf32>
    %47 = tpu.matmul %46, %33, %cst_15 {dimension_numbers = #tpu.dot_dimension_numbers<[1], [0], [0], [1], [0, 0, 1, 1], [], []>} : vector<32x16xbf16>, vector<16x16xbf16>, vector<32x16xf32> -> vector<32x16xf32>
    %48 = vector.extract_strided_slice %47 {offsets = [0, 0], sizes = [16, 16], strides = [1, 1]} : vector<32x16xf32> to vector<16x16xf32>
    %49 = vector.extract_strided_slice %47 {offsets = [16, 0], sizes = [16, 16], strides = [1, 1]} : vector<32x16xf32> to vector<16x16xf32>
    %50 = vector.extract_strided_slice %26 {offsets = [0, 32], sizes = [16, 16], strides = [1, 1]} : vector<16x128xbf16> to vector<16x16xbf16>
    %51 = vector.extract_strided_slice %26 {offsets = [0, 48], sizes = [16, 16], strides = [1, 1]} : vector<16x128xbf16> to vector<16x16xbf16>
    %52 = tpu.concatenate %50, %51 in 0 : vector<16x16xbf16>, vector<16x16xbf16> -> vector<32x16xbf16>
    %53 = vector.extract_strided_slice %25 {offsets = [0, 80], sizes = [16, 16], strides = [1, 1]} : vector<16x128xf32> to vector<16x16xf32>
    %54 = tpu.transpose %53, [1, 0] : vector<16x16xf32> -> vector<16x16xf32>
    %55 = arith.truncf %54 : vector<16x16xf32> to vector<16x16xbf16>
    %56 = vector.extract_strided_slice %26 {offsets = [0, 112], sizes = [16, 16], strides = [1, 1]} : vector<16x128xbf16> to vector<16x16xbf16>
    %cst_16 = arith.constant dense<0.000000e+00> : vector<32x16xf32>
    %57 = tpu.matmul %52, %55, %cst_16 {dimension_numbers = #tpu.dot_dimension_numbers<[1], [0], [0], [1], [0, 0, 1, 1], [], []>} : vector<32x16xbf16>, vector<16x16xbf16>, vector<32x16xf32> -> vector<32x16xf32>
    %58 = arith.addf %57, %3 : vector<32x16xf32>
    %cst_17 = arith.constant dense<0xFF800000> : vector<32xf32>
    %59 = vector.multi_reduction <maximumf>, %58, %cst_17 [1] : vector<32x16xf32> to vector<32xf32>
    %60 = vector.shape_cast %59 : vector<32xf32> to vector<32x1xf32>
    %61 = vector.broadcast %60 : vector<32x1xf32> to vector<32x16xf32>
    %62 = arith.subf %58, %61 : vector<32x16xf32>
    %63 = math.exp %62 : vector<32x16xf32>
    %cst_18 = arith.constant dense<0.000000e+00> : vector<32xf32>
    %64 = vector.multi_reduction <add>, %63, %cst_18 [1] : vector<32x16xf32> to vector<32xf32>
    %65 = vector.shape_cast %64 : vector<32xf32> to vector<32x1xf32>
    %66 = tpu.reciprocal %65 {approx = true} : vector<32x1xf32> -> vector<32x1xf32>
    %67 = vector.broadcast %66 : vector<32x1xf32> to vector<32x16xf32>
    %68 = arith.mulf %63, %67 : vector<32x16xf32>
    %69 = arith.truncf %68 : vector<32x16xf32> to vector<32x16xbf16>
    %cst_19 = arith.constant dense<0.000000e+00> : vector<32x16xf32>
    %70 = tpu.matmul %69, %56, %cst_19 {dimension_numbers = #tpu.dot_dimension_numbers<[1], [0], [0], [1], [0, 0, 1, 1], [], []>} : vector<32x16xbf16>, vector<16x16xbf16>, vector<32x16xf32> -> vector<32x16xf32>
    %71 = vector.extract_strided_slice %70 {offsets = [0, 0], sizes = [16, 16], strides = [1, 1]} : vector<32x16xf32> to vector<16x16xf32>
    %72 = vector.extract_strided_slice %70 {offsets = [16, 0], sizes = [16, 16], strides = [1, 1]} : vector<32x16xf32> to vector<16x16xf32>
    %73 = tpu.concatenate %48, %49, %71, %72 in 1 : vector<16x16xf32>, vector<16x16xf32>, vector<16x16xf32>, vector<16x16xf32> -> vector<16x64xf32>
    %74 = arith.truncf %73 : vector<16x64xf32> to vector<16x64xbf16>
    %c0_20 = arith.constant 0 : index
    %c256 = arith.constant 256 : index
    %75 = vector.load %arg3[%c0_20, %c256] : memref<64x896xbf16, #tpu.memory_space<vmem>>, vector<64x64xbf16>
    %cst_21 = arith.constant dense<0.000000e+00> : vector<16x64xf32>
    %76 = tpu.matmul %74, %75, %cst_21 {dimension_numbers = #tpu.dot_dimension_numbers<[1], [0], [0], [1], [0, 0, 1, 1], [], []>} : vector<16x64xbf16>, vector<64x64xbf16>, vector<16x64xf32> -> vector<16x64xf32>
    %77 = arith.addf %0, %76 : vector<16x64xf32>
    %78 = arith.mulf %77, %77 : vector<16x64xf32>
    %cst_22 = arith.constant dense<0.000000e+00> : vector<16xf32>
    %79 = vector.multi_reduction <add>, %78, %cst_22 [1] : vector<16x64xf32> to vector<16xf32>
    %80 = vector.shape_cast %79 : vector<16xf32> to vector<16x1xf32>
    %cst_23 = arith.constant 6.400000e+01 : f32
    %81 = vector.broadcast %cst_23 : f32 to vector<16x1xf32>
    %82 = arith.divf %80, %81 : vector<16x1xf32>
    %cst_24 = arith.constant 9.99999974E-6 : f32
    %83 = vector.broadcast %cst_24 : f32 to vector<16x1xf32>
    %84 = arith.addf %82, %83 : vector<16x1xf32>
    %85 = math.rsqrt %84 : vector<16x1xf32>
    %86 = vector.broadcast %85 : vector<16x1xf32> to vector<16x64xf32>
    %87 = arith.mulf %77, %86 : vector<16x64xf32>
    %88 = vector.broadcast %5 : vector<1x64xf32> to vector<16x64xf32>
    %89 = arith.mulf %87, %88 : vector<16x64xf32>
    %90 = arith.truncf %89 : vector<16x64xf32> to vector<16x64xbf16>
    %c0_25 = arith.constant 0 : index
    %c384 = arith.constant 384 : index
    %91 = vector.load %arg3[%c0_25, %c384] : memref<64x896xbf16, #tpu.memory_space<vmem>>, vector<64x512xbf16>
    %cst_26 = arith.constant dense<0.000000e+00> : vector<16x512xf32>
    %92 = tpu.matmul %90, %91, %cst_26 {dimension_numbers = #tpu.dot_dimension_numbers<[1], [0], [0], [1], [0, 0, 1, 1], [], []>} : vector<16x64xbf16>, vector<64x512xbf16>, vector<16x512xf32> -> vector<16x512xf32>
    %93 = vector.extract_strided_slice %92 {offsets = [0, 0], sizes = [16, 256], strides = [1, 1]} : vector<16x512xf32> to vector<16x256xf32>
    %94 = vector.extract_strided_slice %92 {offsets = [0, 256], sizes = [16, 256], strides = [1, 1]} : vector<16x512xf32> to vector<16x256xf32>
    %cst_27 = arith.constant 0.000000e+00 : f32
    %95 = vector.broadcast %cst_27 : f32 to vector<16x256xf32>
    %96 = arith.subf %95, %93 : vector<16x256xf32>
    %97 = math.exp %96 : vector<16x256xf32>
    %cst_28 = arith.constant 1.000000e+00 : f32
    %98 = vector.broadcast %cst_28 : f32 to vector<16x256xf32>
    %99 = arith.addf %98, %97 : vector<16x256xf32>
    %100 = tpu.reciprocal %99 {approx = true} : vector<16x256xf32> -> vector<16x256xf32>
    %101 = arith.mulf %93, %100 : vector<16x256xf32>
    %102 = arith.mulf %101, %94 : vector<16x256xf32>
    %103 = arith.truncf %102 : vector<16x256xf32> to vector<16x256xbf16>
    %c0_29 = arith.constant 0 : index
    %c0_30 = arith.constant 0 : index
    %104 = vector.load %arg4[%c0_29, %c0_30] : memref<256x64xbf16, #tpu.memory_space<vmem>>, vector<256x64xbf16>
    %cst_31 = arith.constant dense<0.000000e+00> : vector<16x64xf32>
    %105 = tpu.matmul %103, %104, %cst_31 {dimension_numbers = #tpu.dot_dimension_numbers<[1], [0], [0], [1], [0, 0, 1, 1], [], []>} : vector<16x256xbf16>, vector<256x64xbf16>, vector<16x64xf32> -> vector<16x64xf32>
    %106 = arith.addf %77, %105 : vector<16x64xf32>
    %c0_32 = arith.constant 0 : index
    %c0_33 = arith.constant 0 : index
    %107 = vector.load %arg5[%c0_32, %c0_33] : memref<16x64xf32, #tpu.memory_space<vmem>>, vector<16x64xf32>
    tpu.vector_store %arg5[%c0_32, %c0_33], %106 {strides = array<i32>} : memref<16x64xf32, #tpu.memory_space<vmem>>, vector<16x64xf32>,
    return
  }
  func.func @transform_0(%arg0: i32) -> (i32, i32) {
    %c0_i32 = arith.constant 0 : i32
    %c0_i32_0 = arith.constant 0 : i32
    %c0_i32_1 = arith.constant 0 : i32
    return %c0_i32, %c0_i32_0 : i32, i32
  }
  func.func @transform_1(%arg0: i32) -> (i32, i32) {
    %c0_i32 = arith.constant 0 : i32
    %c0_i32_0 = arith.constant 0 : i32
    %c0_i32_1 = arith.constant 0 : i32
    return %c0_i32, %c0_i32_0 : i32, i32
  }
  func.func @transform_2(%arg0: i32) -> (i32, i32) {
    %c0_i32 = arith.constant 0 : i32
    %c0_i32_0 = arith.constant 0 : i32
    %c0_i32_1 = arith.constant 0 : i32
    return %c0_i32, %c0_i32_0 : i32, i32
  }
  func.func @transform_3(%arg0: i32) -> (i32, i32) {
    %c0_i32 = arith.constant 0 : i32
    %c0_i32_0 = arith.constant 0 : i32
    %c0_i32_1 = arith.constant 0 : i32
    return %c0_i32, %c0_i32_0 : i32, i32
  }
  func.func @transform_4(%arg0: i32) -> (i32, i32) {
    %c0_i32 = arith.constant 0 : i32
    %c0_i32_0 = arith.constant 0 : i32
    %c0_i32_1 = arith.constant 0 : i32
    return %c0_i32, %c0_i32_0 : i32, i32
  }
}

</mosaic_0001>

<bundles_post_ra>
// kernel: tpu_custom_call.1
= control target key start
LH: loop header
LB: loop body
LE: loop exit
PB: predicated region body
PF: predicated region fallthrough
CT: control target
= control target key end

     0   :  { %9 = vsyncpa [#allocation3], 0  ;;  %s1688_s0 = inlined_call_operand.vmem [shape: f32[16,64], index: 0, kind: input, shape index: {}]   ;;  %s1689_s1 = inlined_call_operand.vmem [shape: f32[72,128], index: 1, kind: input, shape index: {}]   ;;  %s1690_s2 = inlined_call_operand.hbm [shape: bf16[64,896], index: 2, kind: input, shape index: {}]   ;;  %s1691_s3 = inlined_call_operand.vmem [shape: bf16[256,64], index: 3, kind: input, shape index: {}]   ;;  %s1692_s4 = inlined_call_operand.hbm [shape: f32[16,64], index: 4, kind: output, shape index: {}]  }
   0x1   :  { %10 = vsyncpa [#allocation4], 0  ;;  %s1444_s15 = smov [#allocation2]   ;;  %s1396_s19 = scalar_lea.hbm %s1690_s2, 3584 }
   0x2   :  { %s20_s16 = sshll.u32 %s1444_s15, 4  ;;  %p1397_p0 = scmp.ne.s32.totalorder %s1690_s2, %s1396_s19  ;;  %s21_s16 = int_to_ptr.vmem [resolvable:$true] %s20_s16 }
   0x3   :  { %p1400_p1 = scmp.lt.u32.totalorder %s1396_s19, %s1690_s2 }
   0x5   :  { %p1402_p2 = pnand %p1400_p1, %p1397_p0 }
   0x7   :  { %1405 = shalt.err (!%p1402_p2)
}
   0x8   :  { %s1406_s24 = scalar_lea.vmem %s21_s16, 3584  ;;  %p1411_p4 = scmp.lt.s32.totalorder %s21_s16, %s21_s16 }
   0x9   :  { %p1407_p3 = scmp.ne.s32.totalorder %s21_s16, %s1406_s24  ;;  %p1412_p5 = scmp.lt.s32.totalorder %s1406_s24, %s1406_s24 }
   0xb   :  { %p1413_p6 = por %p1412_p5, %p1411_p4 }
   0xd   :  { %p1414_p7 = pnand %p1413_p6, %p1407_p3 }
   0xf   :  { %1417 = shalt.err (!%p1414_p7)
}
  0x10   :  { %s1445_s25 = smov 448   ;;  %s1446_s26 = smov 28  }
  0x11   :  { %26 = dma.hbm_to_vmem [thread:$0]  %s1690_s2, 3584, %s21_s16, [#allocation3], %s1445_s25, %s1445_s25, %s1446_s26  }
  0x12   :  { %1440 = dma.done.wait [#allocation3], 3584  }
  0x13   :  { %1441 = vsyncadd [#allocation3], 4294963712  ;;  %v1499_v0 = vld [vmem:[%s1688_s0] sm:$0xff]  ;;  %vm47_vm0 = vcmask 523264   ;;  %v1504_v1 = vld [vmem:[%s1688_s0 + $0x8] sm:$0xff]  ;;  %v1447_v11 = vmov 0  }
  0x14   :  { %v45_v2 = vmul.f32 %v1499_v0, %v1499_v0  ;;  %v46_v3 = vmul.f32 %v1504_v1, %v1504_v1  ;;  %v1284_v6 = vld [vmem:[#allocation2 + $0x4] ss:$28 sps:$4 sm:$0xff]   ;;  %v1287_v8 = vld [vmem:[#allocation2 + $0x3c] ss:$28 sps:$4 sm:$0xff]   ;;  %v1290_v10 = vld [vmem:[#allocation2 + $0x74] ss:$28 sps:$4 sm:$0xff]   ;;  %153 = vmatprep.mubr.bf16.mxu0 %v1447_v11 }
  0x15   :  { %v1286_v7 = vld [vmem:[#allocation2] ss:$28 sps:$4 sm:$0xff]   ;;  %121 = vmatprep.subr.bf16.mxu0 %v1284_v6  ;;  %v1289_v9 = vld [vmem:[#allocation2 + $0x38] ss:$28 sps:$4 sm:$0xff]   ;;  %v1292_v12 = vld [vmem:[#allocation2 + $0x70] ss:$28 sps:$4 sm:$0xff]  }
  0x16   :  { %v48_v4 = vsel %vm47_vm0, %v45_v2, 0.0  ;;  %v51_v5 = vsel %vm47_vm0, %v46_v3, 0.0  ;;  %122 = vmatpush1.bf16.msra.mxu0 %v1286_v7  ;;  %v1293_v13 = vld [vmem:[#allocation2 + $0xac] ss:$28 sps:$4 sm:$0xff]   ;;  %v1116_v24 = vld [vmem:[%s1689_s1 + $0x40] ss:$0 sm:$0xff] }
  0x17   :  { %49 = vadd.xlane.f32.xlu0 %v48_v4  ;;  %123 = vmatprep.subr.bf16.mxu0 %v1287_v8  ;;  %v1295_v14 = vld [vmem:[#allocation2 + $0xa8] ss:$28 sps:$4 sm:$0xff]   ;;  %v37_v30 = vld [vmem:[%s1689_s1 + $0x10] sm:$0xff]  ;;  %v38_v35 = vld [vmem:[%s1689_s1 + $0x18] sm:$0xff]  ;;  %s1448_s15 = smov 64   ;;  %vm215_vm1 = vcmask 130048  }
  0x18   :  { %v35_v29 = vld [vmem:[%s1689_s1] sm:$0xff]  ;;  %v36_v32 = vld [vmem:[%s1689_s1 + $0x8] sm:$0xff]  ;;  %s1449_s16 = smov 112   ;;  %v1546_v53 = vld [vmem:[%s1689_s1 + $0x30] sm:$0xff]  ;;  %s1450_s25 = smov 48   ;;  %vm1455_vm2 = vmmov 0  }
  0x19   :  { %v1541_v51 = vld [vmem:[%s1689_s1 + $0x20] sm:$0xff]  ;;  %v1551_v55 = vld [vmem:[%s1689_s1 + $0x28] sm:$0xff]  ;;  %v1560_v62 = vld [vmem:[%s1689_s1 + $0x38] sm:$0xff]  ;;  %s1451_s26 = smov 32   ;;  %s1452_s27 = smov 96   ;;  %vm603_vm3 = vcmask 261120  }
  0x1a   :  { %124 = vmatpush1.bf16.msra.mxu0 %v1289_v9  ;;  %s1453_s28 = smov 16   ;;  %vm606_vm4 = vcmask 392192  }
  0x1b   :  { %52 = vadd.xlane.f32.xlu0 %v51_v5  ;;  %125 = vmatprep.subr.bf16.mxu0 %v1290_v10 }
  0x1e   :  { %126 = vmatpush1.bf16.msra.mxu0 %v1292_v12 }
  0x1f   :  { %127 = vmatprep.subr.bf16.mxu0 %v1293_v13 }
  0x22   :  { %128 = vmatpush1.bf16.msra.mxu0 %v1295_v14 }
  0xa4   :  { %v50_v15 = vpop.xlane.xlu0 %49 }
  0xa5   :  { %v55_v16 = vmul.f32 0.015625, %v50_v15 }
  0xa7   :  { %v57_v17 = vadd.f32 1e-05, %v55_v16 }
  0xa8   :  { %v53_v18 = vpop.xlane.xlu0 %52 }
  0xa9   :  { %1340 = vrsqrt.f32 %v57_v17  ;;  %v56_v19 = vmul.f32 0.015625, %v53_v18 }
  0xab   :  { %v58_v20 = vadd.f32 1e-05, %v56_v19 }
  0xad   :  { %1342 = vrsqrt.f32 %v58_v20 }
  0xb3   :  { %v1341_v21 = vpop.eup %1340 }
  0xb4   :  { %v61_v22 = vmul.f32 %v1341_v21, %v1499_v0 }
  0xb6   :  { %v67_v26 = vmul.f32 %v1116_v24, %v61_v22 }
  0xb7   :  { %v1343_v23 = vpop.eup %1342 }
  0xb8   :  { %v62_v25 = vmul.f32 %v1343_v23, %v1504_v1 }
  0xba   :  { %v68_v27 = vmul.f32 %v1116_v24, %v62_v25 }
  0xbc   :  { %v69_v28 = vpack.c.bf16 %v68_v27, %v67_v26 }
  0xbe   :  { %1125 = vmatmul.mubr.msk.bf16.vlgmr.msra.gmra.mrb[0].mxu0 %vm47_vm0, %v69_v28 }
  0xbf   :  { %842 = vmatprep.mubr.bf16.mxu0 %v1447_v11 }
 0x191   :  { %v155_v31 = vpop.f32.mrb[0].mxu0 }
 0x192   :  { %v164_v33 = vmul.f32 %v155_v31, %v35_v29  ;;  %v157_v34 = vpop.f32.mrb[1].mxu0 }
 0x193   :  { %v166_v36 = vmul.f32 %v157_v34, %v37_v30  ;;  %v159_v37 = vpop.f32.mrb[2].mxu0 }
 0x194   :  { %v165_v38 = vmul.f32 %v159_v37, %v36_v32  ;;  %v161_v39 = vpop.f32.mrb[3].mxu0 }
 0x195   :  { %v168_v40 = vadd.f32 %v166_v36, %v164_v33  ;;  %v167_v41 = vmul.f32 %v161_v39, %v38_v35 }
 0x197   :  { %v169_v42 = vadd.f32 %v167_v41, %v165_v38  ;;  %176 = vrot.lane.b32.xlu1 %v168_v40, %s1448_s15 }
 0x199   :  { %v1532_v43 = vpack.c.bf16 %v169_v42, %v168_v40  ;;  %v1264_v44 = vpack.i.bf16 %v169_v42, %v168_v40 }
 0x19b   :  { %178 = vrot.lane.b32.xlu1 %v169_v42, %s1448_s15  ;;  %172 = vrot.lane.b32.xlu0 %v1532_v43, %s1449_s16 }
 0x19c   :  { %1215 = vmatprep.mubr.msk.bf16.mxu1 %vm215_vm1, %v1532_v43 }
 0x209   :  { %v177_v45 = vpop.permute.xlu1 %176 }
 0x20a   :  { %182 = vxpose.xlu1.b32.start [1/2] (short) (narrow) %v177_v45, 16 }
 0x20d   :  { %v179_v46 = vpop.permute.xlu1 %178  ;;  %v173_v50 = vpop.permute.xlu0 %172 }
 0x20e   :  { %183 = vxpose.xlu1.b32.end [2/2] (short) (narrow) %v179_v46, 16 }
 0x28a   :  { %v198_v47 = vpop.trf.xlu1 }
 0x28e   :  { %v199_v48 = vpop.trf.xlu1 }
 0x28f   :  { %v214_v49 = vpack.c.bf16 %v199_v48, %v198_v47 }
 0x291   :  { %1213 = vmatprep.subr.bf16.mxu1 %v214_v49 }
 0x292   :  { %1214 = vmatpush3.bf16.msra.mxu1 %v214_v49 }
 0x295   :  { %1216 = vmatmul.mubr.msk.bf16.vlgmr.msra.gmra.mrb[0].mxu1 %vm215_vm1, %v173_v50 }
 0x368   :  { %v1217_v52 = vpop.f32.mrb[0].mxu1 }
 0x369   :  { %v256_v54 = vpop.f32.mrb[1].mxu1  ;;  %v265_v59 = vadd.f32 %v1217_v52, %v1546_v53 }
 0x36a   :  { %v257_v56 = vadd.f32 %v256_v54, %v1541_v51  ;;  %v1218_v57 = vpop.f32.mrb[2].mxu1 }
 0x36b   :  { %v259_v58 = vpop.f32.mrb[3].mxu1  ;;  %v268_v2 = vadd.f32 %v1218_v57, %v1560_v62  ;;  %v277_v3 = vsel %vm215_vm1, %v265_v59, -inf }
 0x36c   :  { %v260_v60 = vadd.f32 %v259_v58, %v1551_v55  ;;  %v271_v61 = vsel %vm215_vm1, %v257_v56, -inf }
 0x36d   :  { %272 = vmax.xlane.f32.xlu0 %v271_v61  ;;  %v280_v4 = vsel %vm215_vm1, %v268_v2, -inf }
 0x36e   :  { %v274_v63 = vsel %vm215_vm1, %v260_v60, -inf }
 0x36f   :  { %275 = vmax.xlane.f32.xlu1 %v274_v63 }
 0x371   :  { %278 = vmax.xlane.f32.xlu0 %v277_v3 }
 0x375   :  { %281 = vmax.xlane.f32.xlu0 %v280_v4 }
 0x38b   :  { %1265 = vrot.lane.b32.xlu0 %v1264_v44, %s1450_s25 }
 0x3fa   :  { %v273_v5 = vpop.xlane.xlu0 %272 }
 0x3fb   :  { %v283_v6 = vsub.f32 %v257_v56, %v273_v5 }
 0x3fc   :  { %v276_v18 = vpop.xlane.xlu1 %275 }
 0x3fd   :  { %v287_v7 = vmul.f32 1.442695, %v283_v6  ;;  %v284_v19 = vsub.f32 %v260_v60, %v276_v18 }
 0x3fe   :  { %v279_v8 = vpop.xlane.xlu0 %278 }
 0x3ff   :  { %1344 = vpow2.f32 %v287_v7  ;;  %v285_v9 = vsub.f32 %v265_v59, %v279_v8  ;;  %v289_v21 = vmul.f32 1.442695, %v284_v19 }
 0x401   :  { %v291_v10 = vmul.f32 1.442695, %v285_v9 }
 0x402   :  { %v282_v16 = vpop.xlane.xlu0 %281 }
 0x403   :  { %1346 = vpow2.f32 %v291_v10  ;;  %v286_v17 = vsub.f32 %v268_v2, %v282_v16 }
 0x405   :  { %v293_v20 = vmul.f32 1.442695, %v286_v17 }
 0x406   :  { %v1266_v26 = vpop.permute.xlu0 %1265 }
 0x407   :  { %1348 = vpow2.f32 %v293_v20  ;;  %v1267_v27 = vunpack.i.l.bf16 %v1266_v26  ;;  %v1268_v28 = vunpack.i.h.bf16 %v1266_v26 }
 0x408   :  { %1350 = vpow2.f32 %v289_v21 }
 0x409   :  { %v1345_v12 = vpop.eup %1344 }
 0x40a   :  { %v295_v13 = vsel %vm215_vm1, %v1345_v12, 0.0 }
 0x40b   :  { %296 = vadd.xlane.f32.xlu0 %v295_v13 }
 0x40d   :  { %v1347_v14 = vpop.eup %1346 }
 0x40e   :  { %v301_v15 = vsel %vm215_vm1, %v1347_v14, 0.0 }
 0x40f   :  { %302 = vadd.xlane.f32.xlu1 %v301_v15 }
 0x411   :  { %v1349_v22 = vpop.eup %1348 }
 0x412   :  { %v304_v23 = vsel %vm215_vm1, %v1349_v22, 0.0  ;;  %v1351_v24 = vpop.eup %1350 }
 0x413   :  { %v298_v25 = vsel %vm215_vm1, %v1351_v24, 0.0 }
 0x420   :  { %317 = vrot.lane.b32.xlu1 %v1532_v43, %s1451_s26 }
 0x421   :  { %416 = vrot.lane.b32.xlu0 %v173_v50, %s1452_s27 }
 0x424   :  { %414 = vrot.lane.b32.xlu1 %v1532_v43, %s1452_s27 }
 0x448   :  { %305 = vadd.xlane.f32.xlu1 %v304_v23 }
 0x44c   :  { %299 = vadd.xlane.f32.xlu1 %v298_v25 }
 0x47f   :  { %381 = vxpose.xlu1.b32.start [1/2] (short) (narrow) %v1267_v27, 16 }
 0x483   :  { %382 = vxpose.xlu1.b32.end [2/2] (short) (narrow) %v1268_v28, 16 }
 0x498   :  { %v297_v32 = vpop.xlane.xlu0 %296 }
 0x49c   :  { %v303_v29 = vpop.xlane.xlu1 %302  ;;  %v417_v49 = vpop.permute.xlu0 %416 }
 0x4a0   :  { %v318_v30 = vpop.permute.xlu1 %317 }
 0x4a1   :  { %1219 = vmatprep.subr.bf16.mxu1 %v318_v30 }
 0x4a2   :  { %1220 = vmatpush3.bf16.msra.mxu1 %v318_v30 }
 0x4a4   :  { %v415_v31 = vpop.permute.xlu1 %414 }
 0x4d5   :  { %v306_v33 = vpop.xlane.xlu1 %305 }
 0x4d6   :  { %1352 = vrcp.f32 %v306_v33 }
 0x4d7   :  { %1354 = vrcp.f32 %v297_v32 }
 0x4d8   :  { %1356 = vrcp.f32 %v303_v29 }
 0x4d9   :  { %v300_v34 = vpop.xlane.xlu1 %299 }
 0x4da   :  { %1358 = vrcp.f32 %v300_v34 }
 0x4e0   :  { %v1353_v35 = vpop.eup %1352 }
 0x4e1   :  { %v1355_v36 = vpop.eup %1354  ;;  %v314_v39 = vmul.f32 %v1353_v35, %v1349_v22 }
 0x4e2   :  { %v1357_v37 = vpop.eup %1356  ;;  %v311_v40 = vmul.f32 %v1355_v36, %v1345_v12 }
 0x4e3   :  { %v313_v42 = vmul.f32 %v1357_v37, %v1347_v14 }
 0x4e4   :  { %v1359_v38 = vpop.eup %1358 }
 0x4e5   :  { %v312_v41 = vmul.f32 %v1359_v38, %v1351_v24  ;;  %v316_v45 = vpack.c.bf16 %v314_v39, %v313_v42  ;;  %v1297_v42 = vld [vmem:[#allocation2 + $0x40] ss:$28 sps:$4 sm:$0xff]  }
 0x4e7   :  { %v315_v44 = vpack.c.bf16 %v312_v41, %v311_v40  ;;  %v1296_v40 = vld [vmem:[#allocation2 + $0x8] ss:$28 sps:$4 sm:$0xff]   ;;  %v1454_v41 = vmov 0.0  }
 0x4e9   :  { %1221 = vmatprep.mubr.msk.bf16.mxu1 %vm215_vm1, %v315_v44  ;;  %v1298_v44 = vld [vmem:[#allocation2 + $0x78] ss:$28 sps:$4 sm:$0xff]  }
 0x4ea   :  { %1222 = vmatmul.mubr.msk.bf16.vlgmr.msra.gmra.mrb[4].mxu1 %vm215_vm1, %v316_v45  ;;  %v1299_v45 = vld [vmem:[#allocation2 + $0xb0] ss:$28 sps:$4 sm:$0xff]  }
 0x4eb   :  { %1227 = vmatprep.mubr.msk.bf16.mxu1 %vm215_vm1, %v415_v31 }
 0x4ff   :  { %v397_v46 = vpop.trf.xlu1 }
 0x503   :  { %v398_v47 = vpop.trf.xlu1 }
 0x504   :  { %v413_v48 = vpack.c.bf16 %v398_v47, %v397_v46 }
 0x506   :  { %1225 = vmatprep.subr.bf16.mxu1 %v413_v48 }
 0x507   :  { %1226 = vmatpush3.bf16.msra.mxu1 %v413_v48 }
 0x50a   :  { %1228 = vmatmul.mubr.msk.bf16.vlgmr.msra.gmra.mrb[8].mxu1 %vm215_vm1, %v417_v49 }
 0x5bd   :  { %v1223_v50 = vpop.f32.mrb[4].mxu1 }
 0x5be   :  { %v1578_v52 = vpop.f32.mrb[5].mxu1 }
 0x5bf   :  { %v1224_v54 = vpop.f32.mrb[6].mxu1 }
 0x5c0   :  { %v1269_v56 = vpack.i.bf16 %v1224_v54, %v1223_v50  ;;  %v1580_v57 = vpop.f32.mrb[7].mxu1 }
 0x5dd   :  { %v1229_v58 = vpop.f32.mrb[8].mxu1 }
 0x5de   :  { %v458_v59 = vpop.f32.mrb[9].mxu1  ;;  %v467_v2 = vadd.f32 %v1229_v58, %v1546_v53 }
 0x5df   :  { %v459_v60 = vadd.f32 %v458_v59, %v1541_v51  ;;  %v1230_v61 = vpop.f32.mrb[10].mxu1 }
 0x5e0   :  { %v461_v63 = vpop.f32.mrb[11].mxu1  ;;  %v470_v6 = vadd.f32 %v1230_v61, %v1560_v62  ;;  %v479_v7 = vsel %vm215_vm1, %v467_v2, -inf }
 0x5e1   :  { %v462_v3 = vadd.f32 %v461_v63, %v1551_v55  ;;  %v473_v4 = vsel %vm215_vm1, %v459_v60, -inf }
 0x5e2   :  { %474 = vmax.xlane.f32.xlu0 %v473_v4  ;;  %v482_v8 = vsel %vm215_vm1, %v470_v6, -inf }
 0x5e3   :  { %v476_v5 = vsel %vm215_vm1, %v462_v3, -inf }
 0x5e4   :  { %477 = vmax.xlane.f32.xlu1 %v476_v5 }
 0x5e6   :  { %480 = vmax.xlane.f32.xlu0 %v479_v7 }
 0x5ea   :  { %483 = vmax.xlane.f32.xlu0 %v482_v8 }
 0x5f5   :  { %1270 = vrot.lane.b32.xlu1 %v1269_v56, %s1453_s28 }
 0x66f   :  { %v475_v51 = vpop.xlane.xlu0 %474 }
 0x670   :  { %v485_v53 = vsub.f32 %v459_v60, %v475_v51 }
 0x671   :  { %v478_v13 = vpop.xlane.xlu1 %477 }
 0x672   :  { %v489_v10 = vmul.f32 1.442695, %v485_v53  ;;  %v486_v62 = vsub.f32 %v462_v3, %v478_v13 }
 0x673   :  { %v481_v9 = vpop.xlane.xlu0 %480 }
 0x674   :  { %v487_v55 = vsub.f32 %v467_v2, %v481_v9  ;;  %v491_v17 = vmul.f32 1.442695, %v486_v62 }
 0x675   :  { %v1271_v56 = vpop.permute.xlu1 %1270 }
 0x676   :  { %v493_v12 = vmul.f32 1.442695, %v487_v55  ;;  %v1273_v59 = vunpack.i.h.bf16 %v1271_v56  ;;  %v1272_v60 = vunpack.i.l.bf16 %v1271_v56  ;;  %v1332_v56 = vld [vmem:[%s1691_s3 + $0x60] sm:$0xff]  }
 0x677   :  { %v484_v14 = vpop.xlane.xlu0 %483 }
 0x678   :  { %1360 = vpow2.f32 %v493_v12  ;;  %v488_v15 = vsub.f32 %v470_v6, %v484_v14  ;;  %v602_v3 = vsel %vm215_vm1, %v1580_v57, %v1273_v59  ;;  %v601_v4 = vsel %vm215_vm1, %v1578_v52, %v1272_v60  ;;  %v1334_v59 = vld [vmem:[%s1691_s3 + $0x68] sm:$0xff]  }
 0x679   :  { %1362 = vpow2.f32 %v489_v10  ;;  %v1335_v60 = vld [vmem:[%s1691_s3 + $0x28] sm:$0xff]  }
 0x67a   :  { %v495_v16 = vmul.f32 1.442695, %v488_v15 }
 0x67c   :  { %1364 = vpow2.f32 %v495_v16  ;;  %v1305_v16 = vld [vmem:[#allocation2 + $0x18] ss:$28 sps:$4 sm:$0xff]  }
 0x67d   :  { %1366 = vpow2.f32 %v491_v17  ;;  %v1300_v17 = vld [vmem:[#allocation2 + $0xc] ss:$28 sps:$4 sm:$0xff]  }
 0x682   :  { %v1361_v18 = vpop.eup %1360 }
 0x683   :  { %v503_v19 = vsel %vm215_vm1, %v1361_v18, 0.0  ;;  %v1363_v20 = vpop.eup %1362 }
 0x684   :  { %504 = vadd.xlane.f32.xlu0 %v503_v19  ;;  %v497_v21 = vsel %vm215_vm1, %v1363_v20, 0.0  ;;  %v1311_v19 = vld [vmem:[#allocation2 + $0x50] ss:$28 sps:$4 sm:$0xff]  }
 0x686   :  { %v1365_v22 = vpop.eup %1364 }
 0x687   :  { %v506_v23 = vsel %vm215_vm1, %v1365_v22, 0.0  ;;  %v1367_v24 = vpop.eup %1366 }
 0x688   :  { %498 = vadd.xlane.f32.xlu0 %v497_v21  ;;  %v500_v25 = vsel %vm215_vm1, %v1367_v24, 0.0  ;;  %v1309_v21 = vld [vmem:[#allocation2 + $0x4c] ss:$28 sps:$4 sm:$0xff]  }
 0x68c   :  { %507 = vadd.xlane.f32.xlu0 %v506_v23  ;;  %v1317_v23 = vld [vmem:[#allocation2 + $0x88] ss:$28 sps:$4 sm:$0xff]  }
 0x690   :  { %501 = vadd.xlane.f32.xlu0 %v500_v25  ;;  %v1315_v25 = vld [vmem:[#allocation2 + $0x84] ss:$28 sps:$4 sm:$0xff]  }
 0x6a6   :  { %519 = vrot.lane.b32.xlu0 %v1532_v43, %s1453_s28 }
 0x711   :  { %v505_v26 = vpop.xlane.xlu0 %504 }
 0x715   :  { %v499_v27 = vpop.xlane.xlu0 %498 }
 0x719   :  { %v508_v28 = vpop.xlane.xlu0 %507 }
 0x71a   :  { %1368 = vrcp.f32 %v508_v28  ;;  %v1318_v28 = vld [vmem:[#allocation2 + $0xb4] ss:$28 sps:$4 sm:$0xff]  }
 0x71b   :  { %1370 = vrcp.f32 %v499_v27  ;;  %v1323_v27 = vld [vmem:[#allocation2 + $0xc0] ss:$28 sps:$4 sm:$0xff]  }
 0x71c   :  { %1372 = vrcp.f32 %v505_v26  ;;  %v1320_v26 = vld [vmem:[#allocation2 + $0xb8] ss:$28 sps:$4 sm:$0xff]  }
 0x71d   :  { %v502_v29 = vpop.xlane.xlu0 %501 }
 0x71e   :  { %1374 = vrcp.f32 %v502_v29  ;;  %v1321_v29 = vld [vmem:[#allocation2 + $0xbc] ss:$28 sps:$4 sm:$0xff]  }
 0x721   :  { %v520_v30 = vpop.permute.xlu0 %519 }
 0x722   :  { %1231 = vmatprep.subr.bf16.mxu1 %v520_v30 }
 0x723   :  { %1232 = vmatpush3.bf16.msra.mxu1 %v520_v30 }
 0x724   :  { %v1369_v31 = vpop.eup %1368  ;;  %1237 = vmatprep.subr.bf16.mxu1 %v1454_v41 }
 0x725   :  { %v1371_v32 = vpop.eup %1370  ;;  %v516_v35 = vmul.f32 %v1369_v31, %v1365_v22  ;;  %v1314_v22 = vld [vmem:[#allocation2 + $0x80] ss:$28 sps:$4 sm:$0xff]  }
 0x726   :  { %v1373_v33 = vpop.eup %1372  ;;  %v513_v36 = vmul.f32 %v1371_v32, %v1363_v20  ;;  %v1306_v20 = vld [vmem:[#allocation2 + $0x44] ss:$28 sps:$4 sm:$0xff]  }
 0x727   :  { %v515_v38 = vmul.f32 %v1373_v33, %v1361_v18  ;;  %v1303_v18 = vld [vmem:[#allocation2 + $0x14] ss:$28 sps:$4 sm:$0xff]  }
 0x728   :  { %v1375_v34 = vpop.eup %1374 }
 0x729   :  { %v514_v37 = vmul.f32 %v1375_v34, %v1367_v24  ;;  %v518_v39 = vpack.c.bf16 %v516_v35, %v515_v38  ;;  %v1312_v24 = vld [vmem:[#allocation2 + $0x7c] ss:$28 sps:$4 sm:$0xff]  }
 0x72b   :  { %v517_v43 = vpack.c.bf16 %v514_v37, %v513_v36 }
 0x72d   :  { %1233 = vmatprep.mubr.msk.bf16.mxu1 %vm215_vm1, %v517_v43  ;;  %v1139_v43 = vld [vmem:[%s1689_s1 + $0x41] ss:$0 sm:$0xff] }
 0x72e   :  { %1234 = vmatmul.mubr.msk.bf16.vlgmr.msra.gmra.mrb[12].mxu1 %vm215_vm1, %v518_v39 }
 0x72f   :  { %1238 = vmatpush3.bf16.msra.mxu1 %v1296_v40  ;;  %1245 = vmatprep.mubr.msk.bf16.mxu1 %vm1455_vm2, %v1454_v41 }
 0x730   :  { %1239 = vmatprep.subr.bf16.mxu1 %v1454_v41 }
 0x733   :  { %1240 = vmatpush3.bf16.msra.mxu1 %v1297_v42 }
 0x734   :  { %1241 = vmatprep.subr.bf16.mxu1 %v1454_v41 }
 0x737   :  { %1242 = vmatpush3.bf16.msra.mxu1 %v1298_v44  ;;  %v1324_v44 = vld [vmem:[%s1691_s3 + $0x40] sm:$0xff]  }
 0x738   :  { %1243 = vmatprep.subr.bf16.mxu1 %v1454_v41 }
 0x73b   :  { %1244 = vmatpush3.bf16.msra.mxu1 %v1299_v45  ;;  %v1325_v45 = vld [vmem:[%s1691_s3] sm:$0xff]  }
 0x73c   :  { %853 = vmatprep.subr.bf16.mxu1 %v1305_v16 }
 0x801   :  { %v1235_v46 = vpop.f32.mrb[12].mxu1 }
 0x802   :  { %v562_v47 = vpop.f32.mrb[13].mxu1 }
 0x803   :  { %v1236_v48 = vpop.f32.mrb[14].mxu1 }
 0x804   :  { %v1279_v49 = vpack.i.bf16 %v1236_v48, %v1235_v46  ;;  %v565_v50 = vpop.f32.mrb[15].mxu1  ;;  %v1326_v46 = vld [vmem:[%s1691_s3 + $0x48] sm:$0xff]   ;;  %v1328_v48 = vld [vmem:[%s1691_s3 + $0x50] sm:$0xff]  }
 0x805   :  { %v1274_v54 = vpack.i.bf16 %v565_v50, %v562_v47  ;;  %v1327_v47 = vld [vmem:[%s1691_s3 + $0x8] sm:$0xff]   ;;  %v1330_v50 = vld [vmem:[%s1691_s3 + $0x58] sm:$0xff]  }
 0x807   :  { %1275 = vrot.lane.b32.xlu0 %v1274_v54, %s1451_s26  ;;  %v1331_v54 = vld [vmem:[%s1691_s3 + $0x18] sm:$0xff]  }
 0x80b   :  { %1280 = vrot.lane.b32.xlu0 %v1279_v49, %s1450_s25  ;;  %v1329_v49 = vld [vmem:[%s1691_s3 + $0x10] sm:$0xff]  }
 0x879   :  { %v1276_v58 = vpop.permute.xlu0 %1275 }
 0x87a   :  { %v1278_v61 = vunpack.i.h.bf16 %v1276_v58  ;;  %v1277_v63 = vunpack.i.l.bf16 %v1276_v58  ;;  %v1333_v58 = vld [vmem:[%s1691_s3 + $0x20] sm:$0xff]  }
 0x87c   :  { %v605_v7 = vsel %vm603_vm3, %v602_v3, %v1278_v61  ;;  %v604_v8 = vsel %vm603_vm3, %v601_v4, %v1277_v63  ;;  %v1336_v61 = vld [vmem:[%s1691_s3 + $0x70] sm:$0xff]   ;;  %v1339_v3 = vld [vmem:[%s1691_s3 + $0x38] sm:$0xff]  }
 0x87d   :  { %v1281_v2 = vpop.permute.xlu0 %1280  ;;  %v1337_v63 = vld [vmem:[%s1691_s3 + $0x30] sm:$0xff]  }
 0x87e   :  { %v1283_v5 = vunpack.i.h.bf16 %v1281_v2  ;;  %v1282_v6 = vunpack.i.l.bf16 %v1281_v2  ;;  %v1338_v2 = vld [vmem:[%s1691_s3 + $0x78] sm:$0xff]   ;;  %s1456_s3 = smov [#allocation5]  }
 0x87f   :  { %s1104_s2 = sshll.u32 %s1456_s3, 4  ;;  %s1105_s2 = int_to_ptr.vmem [resolvable:$true] %s1104_s2 }
 0x880   :  { %v607_v51 = vsel %vm606_vm4, %v604_v8, %v1282_v6  ;;  %v608_v53 = vsel %vm606_vm4, %v605_v7, %v1283_v5  ;;  %s1418_s1 = scalar_lea.vmem %s1105_s2, 256  ;;  %p1423_p9 = scmp.lt.s32.totalorder %s1105_s2, %s1105_s2 }
 0x881   :  { %v609_v9 = vpack.c.bf16 %v608_v53, %v607_v51  ;;  %p1419_p8 = scmp.ne.s32.totalorder %s1105_s2, %s1418_s1  ;;  %p1424_p10 = scmp.lt.s32.totalorder %s1418_s1, %s1418_s1 }
 0x883   :  { %1246 = vmatmul.mubr.msk.bf16.vlgmr.msra.gmra.mrb[16].mxu1 %vm47_vm0, %v609_v9  ;;  %p1425_p11 = por %p1424_p10, %p1423_p9 }
 0x884   :  { %885 = vmatprep.mubr.bf16.mxu1 %v1447_v11  ;;  %854 = vmatpush1.bf16.msra.mxu1 %v1303_v18 }
 0x885   :  { %855 = vmatprep.subr.bf16.mxu1 %v1311_v19  ;;  %p1426_p12 = pnand %p1425_p11, %p1419_p8 }
 0x888   :  { %856 = vmatpush1.bf16.msra.mxu1 %v1309_v21 }
 0x889   :  { %857 = vmatprep.subr.bf16.mxu1 %v1317_v23 }
 0x88c   :  { %858 = vmatpush1.bf16.msra.mxu1 %v1315_v25 }
 0x88d   :  { %859 = vmatprep.subr.bf16.mxu1 %v1323_v27 }
 0x890   :  { %860 = vmatpush1.bf16.msra.mxu1 %v1321_v29 }
 0x956   :  { %v679_v55 = vpop.f32.mrb[16].mxu1 }
 0x957   :  { %v1606_v10 = vadd.f32 %v679_v55, %v1499_v0  ;;  %v1247_v12 = vpop.f32.mrb[17].mxu1  ;;  %v1302_v0 = vld [vmem:[#allocation2 + $0x10] ss:$28 sps:$4 sm:$0xff]  }
 0x958   :  { %v682_v57 = vpop.f32.mrb[18].mxu1  ;;  %810 = vmatprep.subr.bf16.mxu0 %v1302_v0 }
 0x959   :  { %v1609_v13 = vadd.f32 %v682_v57, %v1504_v1  ;;  %v1248_v52 = vpop.f32.mrb[19].mxu1  ;;  %v688_v14 = vmul.f32 %v1606_v10, %v1606_v10  ;;  %811 = vmatpush1.bf16.msra.mxu0 %v1300_v17  ;;  %v1308_v1 = vld [vmem:[#allocation2 + $0x48] ss:$28 sps:$4 sm:$0xff]  }
 0x95a   :  { %812 = vmatprep.subr.bf16.mxu0 %v1308_v1 }
 0x95b   :  { %v690_v15 = vsel %vm47_vm0, %v688_v14, 0.0  ;;  %v689_v62 = vmul.f32 %v1609_v13, %v1609_v13 }
 0x95c   :  { %691 = vadd.xlane.f32.xlu1 %v690_v15 }
 0x95d   :  { %v693_v11 = vsel %vm47_vm0, %v689_v62, 0.0  ;;  %813 = vmatpush1.bf16.msra.mxu0 %v1306_v20 }
 0x95e   :  { %694 = vadd.xlane.f32.xlu0 %v693_v11  ;;  %814 = vmatprep.subr.bf16.mxu0 %v1314_v22 }
 0x961   :  { %815 = vmatpush1.bf16.msra.mxu0 %v1312_v24 }
 0x962   :  { %816 = vmatprep.subr.bf16.mxu0 %v1320_v26 }
 0x965   :  { %817 = vmatpush1.bf16.msra.mxu0 %v1318_v28 }
 0x966   :  { %1191 = vmatprep.subr.bf16.mxu0 %v1324_v44 }
 0x9e9   :  { %v692_v30 = vpop.xlane.xlu1 %691 }
 0x9ea   :  { %v696_v31 = vmul.f32 0.015625, %v692_v30 }
 0x9eb   :  { %v695_v32 = vpop.xlane.xlu0 %694 }
 0x9ec   :  { %v698_v33 = vadd.f32 1e-05, %v696_v31  ;;  %v697_v34 = vmul.f32 0.015625, %v695_v32 }
 0x9ee   :  { %1376 = vrsqrt.f32 %v698_v33  ;;  %v699_v35 = vadd.f32 1e-05, %v697_v34 }
 0x9f0   :  { %1378 = vrsqrt.f32 %v699_v35 }
 0x9f8   :  { %v1377_v36 = vpop.eup %1376 }
 0x9f9   :  { %v702_v37 = vmul.f32 %v1377_v36, %v1606_v10 }
 0x9fa   :  { %v1379_v38 = vpop.eup %1378 }
 0x9fb   :  { %v703_v39 = vmul.f32 %v1379_v38, %v1609_v13  ;;  %v708_v40 = vmul.f32 %v1139_v43, %v702_v37 }
 0x9fd   :  { %v709_v41 = vmul.f32 %v1139_v43, %v703_v39 }
 0x9ff   :  { %v710_v42 = vpack.c.bf16 %v709_v41, %v708_v40 }
 0xa01   :  { %1156 = vmatmul.mubr.msk.bf16.vlgmr.msra.gmra.mrb[4].mxu0 %vm47_vm0, %v710_v42  ;;  %1157 = vmatmul.mubr.msk.bf16.vlgmr.msra.gmra.mrb[20].mxu1 %vm47_vm0, %v710_v42 }
 0xa02   :  { %1192 = vmatpush3.bf16.msra.mxu0 %v1325_v45 }
 0xa03   :  { %1193 = vmatprep.subr.bf16.mxu0 %v1326_v46 }
 0xa06   :  { %1194 = vmatpush3.bf16.msra.mxu0 %v1327_v47 }
 0xa07   :  { %1195 = vmatprep.subr.bf16.mxu0 %v1328_v48 }
 0xa0a   :  { %1196 = vmatpush3.bf16.msra.mxu0 %v1329_v49 }
 0xa0b   :  { %1197 = vmatprep.subr.bf16.mxu0 %v1330_v50 }
 0xa0e   :  { %1198 = vmatpush3.bf16.msra.mxu0 %v1331_v54 }
 0xa0f   :  { %1199 = vmatprep.subr.bf16.mxu0 %v1332_v56 }
 0xa12   :  { %1200 = vmatpush3.bf16.msra.mxu0 %v1333_v58 }
 0xa13   :  { %1201 = vmatprep.subr.bf16.mxu0 %v1334_v59 }
 0xa16   :  { %1202 = vmatpush3.bf16.msra.mxu0 %v1335_v60 }
 0xa17   :  { %1203 = vmatprep.subr.bf16.mxu0 %v1336_v61 }
 0xa1a   :  { %1204 = vmatpush3.bf16.msra.mxu0 %v1337_v63 }
 0xa1b   :  { %1205 = vmatprep.subr.bf16.mxu0 %v1338_v2 }
 0xa1e   :  { %1206 = vmatpush3.bf16.msra.mxu0 %v1339_v3 }
 0xad4   :  { %v844_v4 = vpop.f32.mrb[4].mxu0  ;;  %v887_v5 = vpop.f32.mrb[20].mxu1 }
 0xad5   :  { %v896_v6 = vsub.f32 0.0, %v844_v4  ;;  %v846_v7 = vpop.f32.mrb[5].mxu0  ;;  %v889_v8 = vpop.f32.mrb[21].mxu1 }
 0xad6   :  { %v897_v51 = vsub.f32 0.0, %v846_v7  ;;  %v848_v53 = vpop.f32.mrb[6].mxu0  ;;  %v891_v9 = vpop.f32.mrb[22].mxu1 }
 0xad7   :  { %v900_v55 = vmul.f32 1.442695, %v896_v6  ;;  %v898_v12 = vsub.f32 0.0, %v848_v53  ;;  %v850_v57 = vpop.f32.mrb[7].mxu0  ;;  %v893_v52 = vpop.f32.mrb[23].mxu1 }
 0xad8   :  { %v902_v14 = vmul.f32 1.442695, %v897_v51  ;;  %v899_v15 = vsub.f32 0.0, %v850_v57 }
 0xad9   :  { %1380 = vpow2.f32 %v900_v55  ;;  %v904_v62 = vmul.f32 1.442695, %v898_v12 }
 0xada   :  { %1382 = vpow2.f32 %v902_v14  ;;  %v906_v11 = vmul.f32 1.442695, %v899_v15 }
 0xadb   :  { %1384 = vpow2.f32 %v904_v62 }
 0xadc   :  { %1386 = vpow2.f32 %v906_v11 }
 0xae3   :  { %v1381_v0 = vpop.eup %1380 }
 0xae4   :  { %v1383_v16 = vpop.eup %1382  ;;  %v908_v17 = vadd.f32 1.0, %v1381_v0 }
 0xae5   :  { %v1385_v18 = vpop.eup %1384  ;;  %v909_v1 = vadd.f32 1.0, %v1383_v16 }
 0xae6   :  { %v1387_v19 = vpop.eup %1386  ;;  %1388 = vrcp.f32 %v908_v17  ;;  %v910_v20 = vadd.f32 1.0, %v1385_v18 }
 0xae7   :  { %1390 = vrcp.f32 %v909_v1  ;;  %v911_v21 = vadd.f32 1.0, %v1387_v19 }
 0xae8   :  { %1392 = vrcp.f32 %v910_v20 }
 0xae9   :  { %1394 = vrcp.f32 %v911_v21 }
 0xaf0   :  { %v1389_v22 = vpop.eup %1388 }
 0xaf1   :  { %v1391_v23 = vpop.eup %1390  ;;  %v916_v24 = vmul.f32 %v1389_v22, %v844_v4 }
 0xaf2   :  { %v1393_v25 = vpop.eup %1392  ;;  %v917_v26 = vmul.f32 %v1391_v23, %v846_v7 }
 0xaf3   :  { %v1395_v27 = vpop.eup %1394  ;;  %v920_v28 = vmul.f32 %v916_v24, %v887_v5  ;;  %v918_v29 = vmul.f32 %v1393_v25, %v848_v53 }
 0xaf4   :  { %v921_v30 = vmul.f32 %v917_v26, %v889_v8  ;;  %v919_v31 = vmul.f32 %v1395_v27, %v850_v57 }
 0xaf5   :  { %v922_v32 = vmul.f32 %v918_v29, %v891_v9 }
 0xaf6   :  { %v923_v33 = vmul.f32 %v919_v31, %v893_v52 }
 0xaf7   :  { %v924_v34 = vpack.c.bf16 %v922_v32, %v920_v28 }
 0xaf8   :  { %v925_v35 = vpack.c.bf16 %v923_v33, %v921_v30 }
 0xafa   :  { %1086 = vmatprep.mubr.bf16.mxu0 %v925_v35 }
 0xafb   :  { %1087 = vmatmul.mubr.bf16.vlgmr.msra.gmra.mrb[8].mxu0 %v924_v34 }
 0xbce   :  { %v1207_v36 = vpop.f32.mrb[8].mxu0 }
 0xbcf   :  { %v1208_v37 = vpop.f32.mrb[9].mxu0 }
 0xbd0   :  { %v1209_v38 = vadd.f32 %v1208_v37, %v1207_v36  ;;  %v1210_v43 = vpop.f32.mrb[10].mxu0 }
 0xbd1   :  { %v1211_v39 = vpop.f32.mrb[11].mxu0 }
 0xbd2   :  { %v1095_v40 = vadd.f32 %v1209_v38, %v1606_v10  ;;  %v1212_v41 = vadd.f32 %v1211_v39, %v1210_v43 }
 0xbd4   :  { %1097 = vst.msk [vmem:[#allocation5] sm:$0xff] %vm47_vm0, %v1095_v40  ;;  %v1096_v42 = vadd.f32 %v1212_v41, %v1609_v13 }
 0xbd6   :  { %1098 = vst.msk [vmem:[#allocation5 + $0x8] sm:$0xff] %vm47_vm0, %v1096_v42 }
 0xbd7   :  { %1429 = shalt.err (!%p1426_p12)
}
 0xbd8   :  { %s1430_s9 = scalar_lea.hbm %s1692_s4, 256 }
 0xbd9   :  { %p1431_p13 = scmp.ne.s32.totalorder %s1692_s4, %s1430_s9  ;;  %p1434_p0 = scmp.lt.u32.totalorder %s1430_s9, %s1692_s4 }
 0xbdb   :  { %p1436_p1 = pnand %p1434_p0, %p1431_p13 }
 0xbdd   :  { %1439 = shalt.err (!%p1436_p1)
}
 0xbde   :  { %s1457_s14 = smov 128   ;;  %s1458_s15 = smov 8  }
 0xbdf   :  { %1110 = dma.vmem_to_hbm [thread:$0]  %s1105_s2, 256, %s1692_s4, [#allocation4], %s1457_s14, %s1457_s14, %s1458_s15  }
 0xbe0   :  { %1442 = dma.done.wait [#allocation4], 256  }
 0xbe1   :  { %1443 = vsyncadd [#allocation4], 4294967040 }
 0xbe2   :  { %1114 = vsyncpa [#allocation3], 1 }
 0xbe3   :  { %1115 = vsyncpa [#allocation4], 1 }

</bundles_post_ra>
